<compile_context>
chip_gen: v5e
topology: v5e:2x2
jax: 0.10.0
libtpu: 0.0.40
codegen_flags: <defaults>
</compile_context>

<pallas_src>
import functools

import jax
import jax.numpy as jnp
from jax import lax
from jax.experimental import pallas as pl
from jax.experimental.pallas import tpu as pltpu


def _round_up(x, m):
    return ((x + m - 1) // m) * m


def _colsq_kernel(x_ref, out_ref, *, valid_rows, inner, tile_rows, chunk, lanes):
    """Accumulate per-lane sums of squares into a resident (8, lanes) f32 block.

    grid = (n_splits, inner): axis 0 is 'parallel' (one output block per
    split / TensorCore), axis 1 is the 'arbitrary' reduction over row tiles.
    `valid_rows` is the true (static) row count; tiles that stick out past it
    (boundary tile, or the phantom tile of an odd cdiv split) are row-masked.
    """
    c = pl.program_id(0)
    i = pl.program_id(1)
    row0 = (c * inner + i) * tile_rows          # logical first row of this tile
    lim = valid_rows - row0                     # number of valid rows in it

    @pl.when(i == 0)
    def _():
        out_ref[...] = jnp.zeros_like(out_ref)

    nchunks = tile_rows // chunk
    unroll = True if nchunks <= 8 else 2

    def partial_sum(masked):
        def body(ci, carry):
            off = ci * chunk
            start = pl.multiple_of(off, chunk)
            x = x_ref[pl.ds(start, chunk), :].astype(jnp.float32)
            if masked:
                rid = jax.lax.broadcasted_iota(jnp.int32, (chunk, lanes), 0)
                x = jnp.where(rid + off < lim, x, 0.0)
            # chunk is a multiple of 8 -> the axis-0 sum is plain VPU adds
            # (no per-chunk cross-sublane XLU reduce, no big VMEM temporaries).
            return carry + jnp.sum((x * x).reshape(chunk // 8, 8, lanes), axis=0)

        init = jnp.zeros((8, lanes), jnp.float32)
        return lax.fori_loop(0, nchunks, body, init, unroll=unroll)

    @pl.when(lim >= tile_rows)                  # fully valid tile: no mask
    def _():
        out_ref[...] += partial_sum(False)

    @pl.when(lim < tile_rows)                   # boundary / phantom tile
    def _():
        out_ref[...] += partial_sum(True)


def d_constraint1(d, *, max_tile_rows=8192, max_splits=2):
    """Pallas implementation of D_constraint1.forward(d). Returns a scalar f32."""
    d = jnp.asarray(d)
    assert d.ndim == 2, "d must be (N, K)"
    if jnp.dtype(d.dtype).itemsize > 4:
        d = d.astype(jnp.float32)               # TPU vector path is <= 32-bit
    n, k = d.shape
    itemsize = jnp.dtype(d.dtype).itemsize
    # Native sublane tile height per dtype: f32/i32: 8, bf16: 16, int8/fp8: 32.
    row_align = {4: 8, 2: 16, 1: 32}[itemsize]
    assert max_tile_rows >= row_align

    # Lane-dense repack: view row-major (N, K) as (N*K/128, 128) when exact
    # (pure reshape, no copy, no HBM pass).  Otherwise keep (N, K) as-is.
    if 0 < k < 128 and 128 % k == 0 and n % (128 // k) == 0:
        pack = 128 // k
    else:
        pack = 1
    lanes = pack * k
    rows = (n * k) // lanes                     # == n // pack (all rows valid)
    d_mat = d.reshape(rows, lanes) if pack > 1 else d

    # Row tiling: large blocks (per-grid-step overhead ~0.35us, so 4+ MiB tiles
    # keep it <10% of the HBM stream time); inside each tile a fori_loop over
    # `chunk` rows accumulates into an (8, lanes) carry.
    chunk_target = max(256, row_align)
    if rows <= max_tile_rows:
        tile_rows = _round_up(rows, row_align)
    else:
        tile_rows = _round_up(max_tile_rows, row_align)
    chunk = min(tile_rows, chunk_target)
    tile_rows = _round_up(tile_rows, chunk)
    n_blocks = pl.cdiv(rows, tile_rows)

    # Use both TensorCores (v7x) whenever there are >= 2 row tiles; an odd
    # block count gets one phantom tile (index-clamped, masked to zero).
    # Harmless / sequential on single-TC v5e and v6e.
    n_splits = max_splits if (max_splits > 1 and n_blocks >= 2) else 1
    inner = pl.cdiv(n_blocks, n_splits)

    kernel = functools.partial(
        _colsq_kernel, valid_rows=rows, inner=inner,
        tile_rows=tile_rows, chunk=chunk, lanes=lanes)

    def in_map(c, i):
        # Clamp phantom steps of the cdiv split back to the last real block;
        # the kernel masks their contribution to zero (lim <= 0).
        return (jnp.minimum(c * inner + i, n_blocks - 1), 0)

    tile_bytes = tile_rows * lanes * itemsize
    vmem_limit = int(min(64 << 20, max(32 << 20, 3 * tile_bytes)))

    lane_sums = pl.pallas_call(
        kernel,
        out_shape=jax.ShapeDtypeStruct((n_splits * 8, lanes), jnp.float32),
        grid_spec=pltpu.PrefetchScalarGridSpec(
            num_scalar_prefetch=0,
            grid=(n_splits, inner),
            in_specs=[pl.BlockSpec((tile_rows, lanes), in_map)],
            out_specs=pl.BlockSpec((8, lanes), lambda c, i: (c, 0)),
        ),
        compiler_params=pltpu.CompilerParams(
            dimension_semantics=("parallel", "arbitrary"),
            vmem_limit_bytes=vmem_limit,
        ),
        cost_estimate=pl.CostEstimate(
            flops=2 * n * k,
            transcendentals=0,
            bytes_accessed=n * k * itemsize + n_splits * 8 * lanes * 4,
        ),
    )(d_mat)

    # Tiny epilogue (few ops on a <=(16, lanes) array): fold split/sublane
    # partials, unfold packed lanes back to K columns, Frobenius norm, scale.
    col_sumsq = lane_sums.sum(axis=0)                       # (lanes,)
    if pack > 1:
        col_sumsq = col_sumsq.reshape(pack, k).sum(axis=0)  # diag(d.T @ d)
    resid = col_sumsq - 1.0
    return 0.001 * jnp.sqrt(jnp.sum(resid * resid))


def d_constraint1_ref(d):
    """Pure-JAX reference mirroring the PyTorch module (full Gram + eye mask)."""
    d = jnp.asarray(d, jnp.float32)
    k = d.shape[1]
    eye = jnp.eye(k, dtype=jnp.float32)
    g = jnp.matmul(d.T, d, precision=jax.lax.Precision.HIGHEST)
    return 0.001 * jnp.linalg.norm(g * eye - eye)


if __name__ == "__main__":
    key = jax.random.PRNGKey(0)
    # d: (N, K) — N=64 samples, K=32 subspace basis columns.
    d = jax.random.normal(key, (64, 32), dtype=jnp.float32)

    out = jax.block_until_ready(d_constraint1(d))
    ref = d_constraint1_ref(d)
    assert jnp.allclose(out, ref, rtol=1e-4, atol=1e-6), (out, ref)

    # Extra coverage: boundary-masked packed path, non-packable K, ragged
    # unpacked path, narrow (bf16) input, and a forced multi-block dual-split
    # grid with an odd block count (phantom tile) on small data.
    cases = [
        ((100, 32), jnp.float32, {}),
        ((40, 48), jnp.float32, {}),
        ((61, 32), jnp.float32, {}),
        ((10, 35), jnp.float32, {}),
        ((100, 32), jnp.bfloat16, {}),
        ((2148, 32), jnp.float32, {"max_tile_rows": 64}),
    ]
    for idx, (shape, dt, kwargs) in enumerate(cases):
        dd = jax.random.normal(jax.random.PRNGKey(idx + 1), shape,
                               dtype=jnp.float32).astype(dt)
        o = jax.block_until_ready(d_constraint1(dd, **kwargs))
        r = d_constraint1_ref(dd)
        assert jnp.allclose(o, r, rtol=1e-4, atol=1e-6), (shape, dt, o, r)

    print("KERNEL_OK")
</pallas_src>

<mosaic_0001>
module attributes {stable_mosaic.version = 11 : i64} {
  func.func @_colsq_kernel(%arg0: i32, %arg1: i32, %arg2: memref<16x128xf32, #tpu.memory_space<vmem>>, %arg3: memref<8x128xf32, #tpu.memory_space<vmem>>) attributes {dimension_semantics = [#tpu.dimension_semantics<parallel>, #tpu.dimension_semantics<arbitrary>], iteration_bounds = array<i64: 1, 1>, scalar_prefetch = 0 : i64, scratch_operands = 0 : i64, tpu.core_type = #tpu.core_type<tc>, window_params = [{transform_indices = @transform_0, window_bounds = array<i64: 16, 128>}, {transform_indices = @transform_1, window_bounds = array<i64: 8, 128>}]} {
    %c1_i32 = arith.constant 1 : i32
    %0 = arith.muli %arg0, %c1_i32 : i32
    %1 = arith.addi %0, %arg1 : i32
    %c16_i32 = arith.constant 16 : i32
    %2 = arith.muli %1, %c16_i32 : i32
    %c16_i32_0 = arith.constant 16 : i32
    %3 = arith.subi %c16_i32_0, %2 : i32
    %c0_i32 = arith.constant 0 : i32
    %4 = arith.cmpi eq, %arg1, %c0_i32 : i32
    %5 = arith.extui %4 : i1 to i32
    %c0_i32_1 = arith.constant 0 : i32
    %6 = arith.cmpi ne, %5, %c0_i32_1 : i32
    scf.if %6 {
      %cst = arith.constant 0.000000e+00 : f32
      %13 = vector.broadcast %cst : f32 to vector<8x128xf32>
      %c0 = arith.constant 0 : index
      %c0_6 = arith.constant 0 : index
      %14 = vector.load %arg3[%c0, %c0_6] : memref<8x128xf32, #tpu.memory_space<vmem>>, vector<8x128xf32>
      tpu.vector_store %arg3[%c0, %c0_6], %13 {strides = array<i32>} : memref<8x128xf32, #tpu.memory_space<vmem>>, vector<8x128xf32>,
    } else {
    }
    %c16_i32_2 = arith.constant 16 : i32
    %7 = arith.cmpi sge, %3, %c16_i32_2 : i32
    %8 = arith.extui %7 : i1 to i32
    %c0_i32_3 = arith.constant 0 : i32
    %9 = arith.cmpi ne, %8, %c0_i32_3 : i32
    scf.if %9 {
      %c0 = arith.constant 0 : index
      %c0_6 = arith.constant 0 : index
      %13 = vector.load %arg3[%c0, %c0_6] : memref<8x128xf32, #tpu.memory_space<vmem>>, vector<8x128xf32>
      %cst = arith.constant 0.000000e+00 : f32
      %14 = vector.broadcast %cst : f32 to vector<8x128xf32>
      %c0_i32_7 = arith.constant 0 : i32
      %c16_i32_8 = arith.constant 16 : i32
      %15 = arith.muli %c0_i32_7, %c16_i32_8 : i32
      %16 = tpu.assume_multiple %15, 16 : i32
      %17 = arith.index_cast %16 : i32 to index
      %c0_9 = arith.constant 0 : index
      %18 = vector.load %arg2[%17, %c0_9] : memref<16x128xf32, #tpu.memory_space<vmem>>, vector<16x128xf32>
      %19 = arith.mulf %18, %18 : vector<16x128xf32>
      %20 = vector.shape_cast %19 : vector<16x128xf32> to vector<2x8x128xf32>
      %cst_10 = arith.constant dense<0.000000e+00> : vector<8x128xf32>
      %21 = vector.multi_reduction <add>, %20, %cst_10 [0] : vector<2x8x128xf32> to vector<8x128xf32>
      %22 = arith.addf %14, %21 : vector<8x128xf32>
      %c1_i32_11 = arith.constant 1 : i32
      %23 = arith.addf %13, %22 : vector<8x128xf32>
      %c0_12 = arith.constant 0 : index
      %c0_13 = arith.constant 0 : index
      %24 = vector.load %arg3[%c0_12, %c0_13] : memref<8x128xf32, #tpu.memory_space<vmem>>, vector<8x128xf32>
      tpu.vector_store %arg3[%c0_12, %c0_13], %23 {strides = array<i32>} : memref<8x128xf32, #tpu.memory_space<vmem>>, vector<8x128xf32>,
    } else {
    }
    %c16_i32_4 = arith.constant 16 : i32
    %10 = arith.cmpi slt, %3, %c16_i32_4 : i32
    %11 = arith.extui %10 : i1 to i32
    %c0_i32_5 = arith.constant 0 : i32
    %12 = arith.cmpi ne, %11, %c0_i32_5 : i32
    scf.if %12 {
      %c0 = arith.constant 0 : index
      %c0_6 = arith.constant 0 : index
      %13 = vector.load %arg3[%c0, %c0_6] : memref<8x128xf32, #tpu.memory_space<vmem>>, vector<8x128xf32>
      %cst = arith.constant 0.000000e+00 : f32
      %14 = vector.broadcast %cst : f32 to vector<8x128xf32>
      %c0_i32_7 = arith.constant 0 : i32
      %c16_i32_8 = arith.constant 16 : i32
      %15 = arith.muli %c0_i32_7, %c16_i32_8 : i32
      %16 = tpu.assume_multiple %15, 16 : i32
      %17 = arith.index_cast %16 : i32 to index
      %c0_9 = arith.constant 0 : index
      %18 = vector.load %arg2[%17, %c0_9] : memref<16x128xf32, #tpu.memory_space<vmem>>, vector<16x128xf32>
      %19 = tpu.iota {dimensions = array<i32: 0>} : vector<16x128xi32>
      %20 = vector.broadcast %15 : i32 to vector<16x128xi32>
      %21 = arith.addi %19, %20 : vector<16x128xi32>
      %22 = vector.broadcast %3 : i32 to vector<16x128xi32>
      %23 = arith.cmpi slt, %21, %22 : vector<16x128xi32>
      %cst_10 = arith.constant 0.000000e+00 : f32
      %24 = vector.broadcast %cst_10 : f32 to vector<16x128xf32>
      %25 = arith.select %23, %18, %24 : vector<16x128xi1>, vector<16x128xf32>
      %26 = arith.mulf %25, %25 : vector<16x128xf32>
      %27 = vector.shape_cast %26 : vector<16x128xf32> to vector<2x8x128xf32>
      %cst_11 = arith.constant dense<0.000000e+00> : vector<8x128xf32>
      %28 = vector.multi_reduction <add>, %27, %cst_11 [0] : vector<2x8x128xf32> to vector<8x128xf32>
      %29 = arith.addf %14, %28 : vector<8x128xf32>
      %c1_i32_12 = arith.constant 1 : i32
      %30 = arith.addf %13, %29 : vector<8x128xf32>
      %c0_13 = arith.constant 0 : index
      %c0_14 = arith.constant 0 : index
      %31 = vector.load %arg3[%c0_13, %c0_14] : memref<8x128xf32, #tpu.memory_space<vmem>>, vector<8x128xf32>
      tpu.vector_store %arg3[%c0_13, %c0_14], %30 {strides = array<i32>} : memref<8x128xf32, #tpu.memory_space<vmem>>, vector<8x128xf32>,
    } else {
    }
    return
  }
  func.func @transform_0(%arg0: i32, %arg1: i32) -> (i32, i32) {
    %c1_i32 = arith.constant 1 : i32
    %0 = arith.muli %arg0, %c1_i32 : i32
    %1 = arith.addi %0, %arg1 : i32
    %c0_i32 = arith.constant 0 : i32
    %2 = arith.minsi %1, %c0_i32 : i32
    %c0_i32_0 = arith.constant 0 : i32
    %c0_i32_1 = arith.constant 0 : i32
    return %2, %c0_i32_0 : i32, i32
  }
  func.func @transform_1(%arg0: i32, %arg1: i32) -> (i32, i32) {
    %c0_i32 = arith.constant 0 : i32
    %c0_i32_0 = arith.constant 0 : i32
    return %arg0, %c0_i32 : i32, i32
  }
}

</mosaic_0001>

<bundles_post_ra>
// kernel: tpu_custom_call.1
= control target key start
LH: loop header
LB: loop body
LE: loop exit
PB: predicated region body
PF: predicated region fallthrough
CT: control target
= control target key end

     0   :  { %6 = vsyncpa [#allocation3], 0  ;;  %s173_s0 = inlined_call_operand.hbm [shape: f32[16,128], index: 0, kind: input, shape index: {}]   ;;  %s174_s1 = inlined_call_operand.hbm [shape: f32[8,128], index: 1, kind: output, shape index: {}]  }
   0x1   :  { %7 = vsyncpa [#allocation4], 0  ;;  %s18_s8 = sshll.u32 %s173_s0, 4  ;;  %s153_s9 = smov [#allocation2]   ;;  %s19_s8 = int_to_ptr.hbm [resolvable:$true] %s18_s8 }
   0x2   :  { %s20_s10 = sshll.u32 %s153_s9, 4  ;;  %s154_s11 = smov 128   ;;  %s21_s10 = int_to_ptr.vmem [resolvable:$true] %s20_s10 }
   0x3   :  { %s155_s12 = smov 8  }
   0x4   :  { %26 = dma.hbm_to_vmem [thread:$0]  %s19_s8, 256, %s21_s10, [#allocation3], %s154_s11, %s154_s11, %s155_s12  }
   0x5   :  { %149 = dma.done.wait [#allocation3], 256  }
   0x6   :  { %150 = vsyncadd [#allocation3], 4294967040  ;;  %v48_v0 = vld [vmem:[#allocation2] sm:$0xff]  ;;  %v49_v1 = vld [vmem:[#allocation2 + $0x8] sm:$0xff]  ;;  %s156_s13 = smov [#allocation5]   ;;  %s84_s17 = sshll.u32 %s174_s1, 4  ;;  %s85_s17 = int_to_ptr.hbm [resolvable:$true] %s84_s17 }
   0x7   :  { %v50_v2 = vmul.f32 %v48_v0, %v48_v0  ;;  %v51_v3 = vmul.f32 %v49_v1, %v49_v1  ;;  %s82_s14 = sshll.u32 %s156_s13, 4  ;;  %s83_s14 = int_to_ptr.vmem [resolvable:$true] %s82_s14 }
   0x9   :  { %v52_v4 = vadd.f32 %v51_v3, %v50_v2 }
   0xb   :  { %55 = vst [vmem:[#allocation5] sm:$0xff] %v52_v4 }
   0xc   :  { %87 = dma.vmem_to_hbm [thread:$0]  %s83_s14, 128, %s85_s17, [#allocation4]  }
   0xd   :  { %151 = dma.done.wait [#allocation4], 128  }
   0xe   :  { %152 = vsyncadd [#allocation4], 4294967168 }
   0xf   :  { %92 = vsyncpa [#allocation3], 1 }
  0x10   :  { %93 = vsyncpa [#allocation4], 1 }

</bundles_post_ra>
